<compile_context>
chip_gen: v6e
topology: v6e:2x2x1
jax: 0.10.0
libtpu: 0.0.40
codegen_flags: <defaults>
</compile_context>

<pallas_src>
import functools
import numpy as np
import jax
import jax.numpy as jnp
from jax import lax
from jax.experimental import pallas as pl
from jax.experimental.pallas import tpu as pltpu


_TM_MAX = 2048                  # frame-row tile cap (amortizes basis HBM re-reads)
_TF_CAP = 1408                  # max frequency-bin tile (8192 -> 3x1408, 2048 -> 1x1152)
_VMEM_BUDGET = 40 * 2 ** 20     # 2x acc + double-buffered frame/basis blocks (v7x-safe)
_VMEM_LIMIT = 54 * 2 ** 20      # scoped VMEM limit: < 64 MiB/TC on v7x, loose on v5e/v6e


def _round_up(x, m):
    return (x + m - 1) // m * m


def _cdiv(a, b):
    return -(-a // b)


def _windowed_dft_basis(n_fft, n_pad, tf, num_f_tiles, dtype):
    """Windowed DFT basis, laid out per frequency tile as [hann*cos | -hann*sin].

    Per tile ft: columns [ft*2tf, ft*2tf+tf) = hann*cos, [ft*2tf+tf, (ft+1)*2tf) =
    -hann*sin for bins ft*tf .. min((ft+1)*tf, F). Zero-padded rows (>= n_fft) and
    zero-padded bins contribute exactly 0 to the loss.
    """
    win = np.hanning(n_fft).astype(np.float64)
    F = n_fft // 2 + 1
    n = np.arange(n_fft, dtype=np.float64)[:, None]
    basis = np.zeros((n_pad, num_f_tiles * 2 * tf), dtype=np.float32)
    for ft in range(num_f_tiles):
        k0 = ft * tf
        k1 = min(k0 + tf, F)
        if k1 <= k0:
            continue
        kk = np.arange(k0, k1, dtype=np.float64)[None, :]
        ang = 2.0 * np.pi * n * kk / float(n_fft)
        c0 = ft * 2 * tf
        basis[:n_fft, c0:c0 + (k1 - k0)] = win[:, None] * np.cos(ang)
        basis[:n_fft, c0 + tf:c0 + tf + (k1 - k0)] = -win[:, None] * np.sin(ang)
    # narrow storage (f32 accumulation in the kernel) halves HBM/VMEM bytes.
    return jnp.asarray(basis, dtype=dtype)


def _extract_frames(x, n_fft, hop):
    """x: (R, T) -> (R * n_frames, n_fft); center=False framing, like torch.stft."""
    R, T = x.shape
    if T < n_fft:
        raise ValueError(f"signal length {T} is shorter than n_fft {n_fft}")
    n_frames = 1 + (T - n_fft) // hop
    if n_fft % hop == 0:
        # Overlap expressed as a concat of hop-blocked shifted slices: contiguous
        # copies only (no XLA gather, no per-element index arithmetic).
        nc = n_fft // hop
        n_hops = n_frames - 1 + nc
        sig = x[:, :n_hops * hop].reshape(R, n_hops, hop)
        frames = jnp.concatenate(
            [sig[:, j:j + n_frames, :] for j in range(nc)], axis=-1)
    else:  # generic fallback (non-divisible hop)
        idx = np.arange(n_frames)[:, None] * hop + np.arange(n_fft)[None, :]
        frames = x[:, idx]
    return frames.reshape(R * n_frames, n_fft), n_frames


def _pick_tm(m_actual, tm_cap):
    """Balance the frame-row tile against the true frame count.

    Multiple of 16 (bf16 sublane packing), at most ~1 tile of padding, and an even
    tile count when tiled so the megacore-parallel m axis stays load-balanced.
    """
    n_tiles = _cdiv(m_actual, tm_cap)
    if n_tiles > 1 and n_tiles % 2 == 1:
        n_tiles += 1
    tm = _round_up(max(_cdiv(m_actual, n_tiles), 16), 16)
    return min(tm, tm_cap)


def _stft_diff_kernel(frames_ref, basis_ref, out_ref, acc_ref, *, tf):
    """One (m, f, k) grid step of |STFT(target - predict)| accumulation.

    acc += frames @ [hann*cos | -hann*sin]  (bf16 MXU matmul, f32 accumulate).
    On the last k step, sqrt(re^2 + im^2) of this frequency tile is accumulated into
    the resident, lane-dense (tm, 128) output block (column-chunked so VMEM
    temporaries stay ~1 MiB regardless of tm/tf).
    """
    f = pl.program_id(1)
    k = pl.program_id(2)
    nk = pl.num_programs(2)
    tm = acc_ref.shape[0]

    @pl.when(jnp.logical_and(f == 0, k == 0))
    def _():
        out_ref[...] = jnp.zeros_like(out_ref)

    @pl.when(k == 0)
    def _():
        acc_ref[...] = jnp.zeros_like(acc_ref)

    acc_ref[...] += jnp.dot(frames_ref[...], basis_ref[...],
                            preferred_element_type=jnp.float32)

    @pl.when(k == nk - 1)
    def _():
        def body(c, p):
            re = acc_ref[:, pl.ds(pl.multiple_of(c * 128, 128), 128)]
            im = acc_ref[:, pl.ds(pl.multiple_of(tf + c * 128, 128), 128)]
            return p + jnp.sqrt(re * re + im * im)        # (tm, 128) partial sums

        out_ref[...] += lax.fori_loop(0, tf // 128, body,
                                      jnp.zeros((tm, 128), jnp.float32))


def _scale_loss(frames, basis, m_actual, f_actual, tm, tk, tf):
    m_pad, n_pad = frames.shape
    num_f_tiles = basis.shape[1] // (2 * tf)
    num_m_tiles = m_pad // tm
    grid = (num_m_tiles, num_f_tiles, n_pad // tk)
    partial = pl.pallas_call(
        functools.partial(_stft_diff_kernel, tf=tf),
        out_shape=jax.ShapeDtypeStruct((m_pad, 128), jnp.float32),
        grid_spec=pltpu.PrefetchScalarGridSpec(
            num_scalar_prefetch=0,
            grid=grid,
            in_specs=[
                pl.BlockSpec((tm, tk), lambda m, f, k: (m, k)),       # diff frames
                pl.BlockSpec((tk, 2 * tf), lambda m, f, k: (k, f)),   # windowed DFT basis
            ],
            out_specs=pl.BlockSpec((tm, 128), lambda m, f, k: (m, 0)),
            scratch_shapes=[pltpu.VMEM((tm, 2 * tf), jnp.float32)],   # re|im accumulator
        ),
        compiler_params=pltpu.CompilerParams(
            dimension_semantics=("parallel", "arbitrary", "arbitrary"),
            vmem_limit_bytes=_VMEM_LIMIT),
    )(frames, basis)
    # padded rows / padded frequency bins contribute exactly 0 -> divide by true count
    return jnp.sum(partial) / jnp.float32(m_actual * f_actual)


class MRSTFTCLoss:
    """Multi-resolution STFT loss forward pass (Pallas TPU).

    loss = mean_over_scales( mean( |STFT(target) - STFT(predict)| ) )

    STFT linearity is exploited: the target-predict difference is framed once and
    matmul'd against a fused (hann-window x DFT) basis on the MXU.
    """

    def __init__(self, scales=(8192, 2048, 512, 128), overlap=0.75, pre_emp=False,
                 compute_dtype=jnp.bfloat16):
        print('> [Loss] --- Multi-resolution STFT Loss ---')
        if pre_emp:
            # TODO(synk): DC_PreEmph pre-emphasis filter not implemented.
            raise NotImplementedError("pre_emp=True is not supported")
        self.scales = list(scales)
        self.overlap = overlap
        self.num_scales = len(self.scales)
        self.compute_dtype = compute_dtype
        # deterministic "parameters": Hann windows (folded into the DFT basis)
        self.windows = [np.hanning(s).astype(np.float32) for s in self.scales]

        self._cfg = {}
        for s in self.scales:
            # tiny eps guards against spurious float round-down; exact (and identical
            # to torch's int()) for power-of-two scales with overlap=0.75.
            hop = int((1.0 - self.overlap) * s + 1e-9)
            if hop <= 0:
                raise ValueError(f"overlap={self.overlap} gives hop <= 0 for scale {s}")
            F = s // 2 + 1
            n_pad = _round_up(s, 128)
            tk = next(c for c in (512, 256, 128) if n_pad % c == 0)
            # frequency tiling: choose tile count first, then a tight 128-aligned tf
            f128 = _round_up(F, 128)
            num_f_tiles = _cdiv(f128, _TF_CAP)            # 8192 -> 3x1408, 2048 -> 1x1152
            tf = _round_up(_cdiv(f128, num_f_tiles), 128)
            # v7x-safe VMEM budget: 2x f32 accumulator (acc + dot result) plus
            # double-buffered bf16 frame and basis blocks.
            basis_db = 2 * tk * (2 * tf) * 2
            per_row = 2 * (2 * tf) * 4 + 2 * tk * 2
            tm_cap = max(16, min(_TM_MAX,
                                 ((_VMEM_BUDGET - basis_db) // per_row) // 16 * 16))
            self._cfg[s] = dict(
                F=F, n_pad=n_pad, hop=hop, tk=tk, tf=tf, tm_cap=tm_cap,
                basis=_windowed_dft_basis(s, n_pad, tf, num_f_tiles, compute_dtype))
            # NOTE: bf16 basis/frames with f32 accumulation; if precision at strongly
            # cancelling bins matters for very large n_fft, pass compute_dtype=float32.

    def __call__(self, predict, target):
        p = jnp.asarray(predict, jnp.float32).reshape(-1, predict.shape[-1])
        t = jnp.asarray(target, jnp.float32).reshape(-1, target.shape[-1])
        # STFT is linear: STFT(target) - STFT(predict) == STFT(target - predict).
        # Compute the difference once (f32), then frame/transform it (halves frame
        # HBM streaming vs. transforming both signals).
        diff = (t - p).astype(self.compute_dtype)
        total = jnp.float32(0.0)
        for s in self.scales:
            cfg = self._cfg[s]
            frames, _ = _extract_frames(diff, s, cfg['hop'])
            m_actual = frames.shape[0]
            tm = _pick_tm(m_actual, cfg['tm_cap'])
            m_pad = _round_up(m_actual, tm)
            frames_p = jnp.pad(frames,
                               ((0, m_pad - m_actual), (0, cfg['n_pad'] - s)))
            total = total + _scale_loss(frames_p, cfg['basis'], m_actual,
                                        cfg['F'], tm, cfg['tk'], cfg['tf'])
        return total / jnp.float32(self.num_scales)


def _reference_loss(predict, target, scales, overlap):
    # pure-JAX f32 reference: same math as torch.stft(center=False) + mean |diff|
    x = jnp.asarray(predict, jnp.float32).reshape(-1, predict.shape[-1])
    xo = jnp.asarray(target, jnp.float32).reshape(-1, target.shape[-1])
    total = jnp.float32(0.0)
    for s in scales:
        hop = int((1.0 - overlap) * s + 1e-9)
        win = jnp.asarray(np.hanning(s), dtype=jnp.float32)
        fp, _ = _extract_frames(x, s, hop)
        ft, _ = _extract_frames(xo, s, hop)
        sp = jnp.fft.rfft(fp * win, axis=-1)
        st = jnp.fft.rfft(ft * win, axis=-1)
        total = total + jnp.mean(jnp.abs(st - sp))
    return total / len(scales)


if __name__ == "__main__":
    key = jax.random.PRNGKey(0)
    k1, k2 = jax.random.split(key)
    B, C, T = 2, 1, 1024
    predict = jax.random.normal(k1, (B, C, T), dtype=jnp.float32)
    target = jax.random.normal(k2, (B, C, T), dtype=jnp.float32)

    # small scales for the demo (scales are a constructor argument of the module)
    scales = [256, 128, 64]
    loss_fn = MRSTFTCLoss(scales=scales, overlap=0.75)

    loss = jax.block_until_ready(loss_fn(predict, target))
    ref = jax.block_until_ready(_reference_loss(predict, target, scales, 0.75))

    assert np.isfinite(float(loss))
    np.testing.assert_allclose(float(loss), float(ref), rtol=2e-2)
    print("KERNEL_OK")
</pallas_src>

<mosaic_0001>
module attributes {stable_mosaic.version = 11 : i64} {
  func.func @_stft_diff_kernel(%arg0: i32, %arg1: i32, %arg2: i32, %arg3: memref<32x256xbf16, #tpu.memory_space<vmem>>, %arg4: memref<256x512xbf16, #tpu.memory_space<vmem>>, %arg5: memref<32x128xf32, #tpu.memory_space<vmem>>, %arg6: memref<32x512xf32, #tpu.memory_space<vmem>>) attributes {dimension_semantics = [#tpu.dimension_semantics<parallel>, #tpu.dimension_semantics<arbitrary>, #tpu.dimension_semantics<arbitrary>], iteration_bounds = array<i64: 1, 1, 1>, scalar_prefetch = 0 : i64, scratch_operands = 1 : i64, tpu.core_type = #tpu.core_type<tc>, window_params = [{transform_indices = @transform_0, window_bounds = array<i64: 32, 256>}, {transform_indices = @transform_1, window_bounds = array<i64: 256, 512>}, {transform_indices = @transform_2, window_bounds = array<i64: 32, 128>}]} {
    %c0_i32 = arith.constant 0 : i32
    %0 = arith.cmpi eq, %arg1, %c0_i32 : i32
    %c0_i32_0 = arith.constant 0 : i32
    %1 = arith.cmpi eq, %arg2, %c0_i32_0 : i32
    %2 = arith.andi %0, %1 : i1
    %3 = arith.extui %2 : i1 to i32
    %c0_i32_1 = arith.constant 0 : i32
    %4 = arith.cmpi ne, %3, %c0_i32_1 : i32
    scf.if %4 {
      %cst_13 = arith.constant 0.000000e+00 : f32
      %17 = vector.broadcast %cst_13 : f32 to vector<32x128xf32>
      %c0_14 = arith.constant 0 : index
      %c0_15 = arith.constant 0 : index
      %18 = vector.load %arg5[%c0_14, %c0_15] : memref<32x128xf32, #tpu.memory_space<vmem>>, vector<32x128xf32>
      tpu.vector_store %arg5[%c0_14, %c0_15], %17 {strides = array<i32>} : memref<32x128xf32, #tpu.memory_space<vmem>>, vector<32x128xf32>,
    } else {
    }
    %c0_i32_2 = arith.constant 0 : i32
    %5 = arith.cmpi eq, %arg2, %c0_i32_2 : i32
    %6 = arith.extui %5 : i1 to i32
    %c0_i32_3 = arith.constant 0 : i32
    %7 = arith.cmpi ne, %6, %c0_i32_3 : i32
    scf.if %7 {
      %cst_13 = arith.constant 0.000000e+00 : f32
      %17 = vector.broadcast %cst_13 : f32 to vector<32x512xf32>
      %c0_14 = arith.constant 0 : index
      %c0_15 = arith.constant 0 : index
      %18 = vector.load %arg6[%c0_14, %c0_15] : memref<32x512xf32, #tpu.memory_space<vmem>>, vector<32x512xf32>
      tpu.vector_store %arg6[%c0_14, %c0_15], %17 {strides = array<i32>} : memref<32x512xf32, #tpu.memory_space<vmem>>, vector<32x512xf32>,
    } else {
    }
    %c0 = arith.constant 0 : index
    %c0_4 = arith.constant 0 : index
    %8 = vector.load %arg6[%c0, %c0_4] : memref<32x512xf32, #tpu.memory_space<vmem>>, vector<32x512xf32>
    %c0_5 = arith.constant 0 : index
    %c0_6 = arith.constant 0 : index
    %9 = vector.load %arg3[%c0_5, %c0_6] : memref<32x256xbf16, #tpu.memory_space<vmem>>, vector<32x256xbf16>
    %c0_7 = arith.constant 0 : index
    %c0_8 = arith.constant 0 : index
    %10 = vector.load %arg4[%c0_7, %c0_8] : memref<256x512xbf16, #tpu.memory_space<vmem>>, vector<256x512xbf16>
    %cst = arith.constant dense<0.000000e+00> : vector<32x512xf32>
    %11 = tpu.matmul %9, %10, %cst {dimension_numbers = #tpu.dot_dimension_numbers<[1], [0], [0], [1], [0, 0, 1, 1], [], []>} : vector<32x256xbf16>, vector<256x512xbf16>, vector<32x512xf32> -> vector<32x512xf32>
    %12 = arith.addf %8, %11 : vector<32x512xf32>
    %c0_9 = arith.constant 0 : index
    %c0_10 = arith.constant 0 : index
    %13 = vector.load %arg6[%c0_9, %c0_10] : memref<32x512xf32, #tpu.memory_space<vmem>>, vector<32x512xf32>
    tpu.vector_store %arg6[%c0_9, %c0_10], %12 {strides = array<i32>} : memref<32x512xf32, #tpu.memory_space<vmem>>, vector<32x512xf32>,
    %c0_i32_11 = arith.constant 0 : i32
    %14 = arith.cmpi eq, %arg2, %c0_i32_11 : i32
    %15 = arith.extui %14 : i1 to i32
    %c0_i32_12 = arith.constant 0 : i32
    %16 = arith.cmpi ne, %15, %c0_i32_12 : i32
    scf.if %16 {
      %c0_13 = arith.constant 0 : index
      %c0_14 = arith.constant 0 : index
      %17 = vector.load %arg5[%c0_13, %c0_14] : memref<32x128xf32, #tpu.memory_space<vmem>>, vector<32x128xf32>
      %cst_15 = arith.constant 0.000000e+00 : f32
      %18 = vector.broadcast %cst_15 : f32 to vector<32x128xf32>
      %c0_i32_16 = arith.constant 0 : i32
      %c2_i32 = arith.constant 2 : i32
      %19 = arith.addi %c0_i32_16, %c2_i32 : i32
      %c1_i32 = arith.constant 1 : i32
      %20 = scf.for %arg7 = %c0_i32_16 to %19 step %c1_i32 iter_args(%arg8 = %18) -> (vector<32x128xf32>)  : i32 {
        %c128_i32 = arith.constant 128 : i32
        %23 = arith.muli %arg7, %c128_i32 : i32
        %24 = tpu.assume_multiple %23, 128 : i32
        %c0_20 = arith.constant 0 : index
        %25 = arith.index_cast %24 : i32 to index
        %26 = vector.load %arg6[%c0_20, %25] : memref<32x512xf32, #tpu.memory_space<vmem>>, vector<32x128xf32>
        %c128_i32_21 = arith.constant 128 : i32
        %27 = arith.muli %arg7, %c128_i32_21 : i32
        %c256_i32 = arith.constant 256 : i32
        %28 = arith.addi %c256_i32, %27 : i32
        %29 = tpu.assume_multiple %28, 128 : i32
        %c0_22 = arith.constant 0 : index
        %30 = arith.index_cast %29 : i32 to index
        %31 = vector.load %arg6[%c0_22, %30] : memref<32x512xf32, #tpu.memory_space<vmem>>, vector<32x128xf32>
        %32 = arith.mulf %26, %26 : vector<32x128xf32>
        %33 = arith.mulf %31, %31 : vector<32x128xf32>
        %34 = arith.addf %32, %33 : vector<32x128xf32>
        %35 = math.sqrt %34 : vector<32x128xf32>
        %36 = arith.addf %arg8, %35 : vector<32x128xf32>
        scf.yield %36 : vector<32x128xf32>
      }
      %c2_i32_17 = arith.constant 2 : i32
      %21 = arith.addf %17, %20 : vector<32x128xf32>
      %c0_18 = arith.constant 0 : index
      %c0_19 = arith.constant 0 : index
      %22 = vector.load %arg5[%c0_18, %c0_19] : memref<32x128xf32, #tpu.memory_space<vmem>>, vector<32x128xf32>
      tpu.vector_store %arg5[%c0_18, %c0_19], %21 {strides = array<i32>} : memref<32x128xf32, #tpu.memory_space<vmem>>, vector<32x128xf32>,
    } else {
    }
    return
  }
  func.func @transform_0(%arg0: i32, %arg1: i32, %arg2: i32) -> (i32, i32) {
    %c0_i32 = arith.constant 0 : i32
    return %arg0, %arg2 : i32, i32
  }
  func.func @transform_1(%arg0: i32, %arg1: i32, %arg2: i32) -> (i32, i32) {
    %c0_i32 = arith.constant 0 : i32
    return %arg2, %arg1 : i32, i32
  }
  func.func @transform_2(%arg0: i32, %arg1: i32, %arg2: i32) -> (i32, i32) {
    %c0_i32 = arith.constant 0 : i32
    %c0_i32_0 = arith.constant 0 : i32
    return %arg0, %c0_i32 : i32, i32
  }
}

</mosaic_0001>

<bundles_post_ra>
// kernel: tpu_custom_call.1
= control target key start
LH: loop header
LB: loop body
LE: loop exit
PB: predicated region body
PF: predicated region fallthrough
CT: control target
= control target key end

     0   :  { %7 = vsyncpa [#allocation4], 0  ;;  %s1170_s0 = inlined_call_operand.hbm [shape: bf16[32,256], index: 0, kind: input, shape index: {}]   ;;  %s1171_s1 = inlined_call_operand.hbm [shape: bf16[256,512], index: 1, kind: input, shape index: {}]   ;;  %s1172_s2 = inlined_call_operand.hbm [shape: f32[32,128], index: 2, kind: output, shape index: {}]  }
   0x1   :  { %8 = vsyncpa [#allocation7], 0 }
   0x2   :  { %9 = vsyncpa [#allocation5], 0  ;;  %s1092_s9 = smov [#allocation3]  }
   0x3   :  { %s15_s10 = sshll.u32 %s1092_s9, 4  ;;  %s16_s10 = int_to_ptr.vmem [resolvable:$true] %s15_s10 }
   0x4   :  { %s994_s11 = scalar_lea.vmem %s16_s10, 512  ;;  %p999_p1 = scmp.lt.s32.totalorder %s16_s10, %s16_s10 }
   0x5   :  { %p995_p0 = scmp.ne.s32.totalorder %s16_s10, %s994_s11  ;;  %p1000_p2 = scmp.lt.s32.totalorder %s994_s11, %s994_s11 }
   0x7   :  { %p1001_p3 = por %p1000_p2, %p999_p1 }
   0x9   :  { %p1002_p4 = pnand %p1001_p3, %p995_p0 }
   0xb   :  { %1005 = shalt.err (!%p1002_p4)
}
   0xc   :  { %s1093_s12 = smov 128   ;;  %s1094_s13 = smov 8  }
   0xd   :  { %21 = dma.hbm_to_vmem [thread:$0]  %s1170_s0, 512, %s16_s10, [#allocation4], %s1093_s12, %s1093_s12, %s1094_s13  }
   0xe   :  { %s1095_s16 = smov [#allocation6]  }
   0xf   :  { %s27_s17 = sshll.u32 %s1095_s16, 4  ;;  %s28_s17 = int_to_ptr.vmem [resolvable:$true] %s27_s17 }
  0x10   :  { %s1014_s18 = scalar_lea.vmem %s28_s17, 8192  ;;  %p1019_p6 = scmp.lt.s32.totalorder %s28_s17, %s28_s17 }
  0x11   :  { %p1015_p5 = scmp.ne.s32.totalorder %s28_s17, %s1014_s18  ;;  %p1020_p7 = scmp.lt.s32.totalorder %s1014_s18, %s1014_s18 }
  0x13   :  { %p1021_p8 = por %p1020_p7, %p1019_p6 }
  0x15   :  { %p1022_p9 = pnand %p1021_p8, %p1015_p5 }
  0x17   :  { %1025 = shalt.err (!%p1022_p9)
}
  0x18   :  { %s1096_s19 = smov 256   ;;  %s1097_s20 = smov 16  }
  0x19   :  { %33 = dma.hbm_to_vmem [thread:$0]  %s1171_s1, 8192, %s28_s17, [#allocation7], %s1096_s19, %s1096_s19, %s1097_s20  }
  0x1a   :  { %1066 = dma.done.wait [#allocation4], 512  }
  0x1b   :  { %1067 = vsyncadd [#allocation4], 4294966784 }
  0x1c   :  { %1068 = dma.done.wait [#allocation7], 8192  }
  0x1d   :  { %1069 = vsyncadd [#allocation7], 4294959104  ;;  %v1098_v0 = vmov 0.0   ;;  %v876_v1 = vld [vmem:[#allocation6 + $0xe4] ss:$16 sps:$4 sm:$0xff]   ;;  %s1132_s0 = smov 0  }
  0x1e   :  { %46 = vst [vmem:[#allocation8] sm:$0xff] %v1098_v0  ;;  %47 = vst [vmem:[#allocation8 + $0x8] sm:$0xff] %v1098_v0  ;;  %v878_v2 = vld [vmem:[#allocation6 + $0xec] ss:$16 sps:$4 sm:$0xff]   ;;  %493 = vmatprep.subr.bf16.mxu0 %v876_v1  ;;  %v880_v3 = vld [vmem:[#allocation6 + $0xe0] ss:$16 sps:$4 sm:$0xff]  }
  0x1f   :  { %48 = vst [vmem:[#allocation8 + $0x10] sm:$0xff] %v1098_v0  ;;  %49 = vst [vmem:[#allocation8 + $0x18] sm:$0xff] %v1098_v0  ;;  %v881_v4 = vld [vmem:[#allocation6 + $0xe8] ss:$16 sps:$4 sm:$0xff]   ;;  %546 = vmatprep.subr.bf16.mxu1 %v878_v2  ;;  %v882_v5 = vld [vmem:[#allocation6 + $0xc4] ss:$16 sps:$4 sm:$0xff]   ;;  %494 = vmatpush1.bf16.msra.mxu0 %v880_v3 }
  0x20   :  { %547 = vmatpush1.bf16.msra.mxu1 %v881_v4  ;;  %v884_v6 = vld [vmem:[#allocation6 + $0xcc] ss:$16 sps:$4 sm:$0xff]   ;;  %v886_v7 = vld [vmem:[#allocation6 + $0xc0] ss:$16 sps:$4 sm:$0xff]   ;;  %495 = vmatprep.subr.bf16.mxu0 %v882_v5  ;;  %v887_v8 = vld [vmem:[#allocation6 + $0xc8] ss:$16 sps:$4 sm:$0xff]  }
  0x21   :  { %548 = vmatprep.subr.bf16.mxu1 %v884_v6  ;;  %v888_v9 = vld [vmem:[#allocation6 + $0xa4] ss:$16 sps:$4 sm:$0xff]   ;;  %v890_v10 = vld [vmem:[#allocation6 + $0xac] ss:$16 sps:$4 sm:$0xff]   ;;  %v892_v11 = vld [vmem:[#allocation6 + $0xa0] ss:$16 sps:$4 sm:$0xff]  }
  0x22   :  { %v893_v12 = vld [vmem:[#allocation6 + $0xa8] ss:$16 sps:$4 sm:$0xff]   ;;  %v894_v13 = vld [vmem:[#allocation6 + $0x84] ss:$16 sps:$4 sm:$0xff]   ;;  %v896_v14 = vld [vmem:[#allocation6 + $0x8c] ss:$16 sps:$4 sm:$0xff]  }
  0x23   :  { %496 = vmatpush1.bf16.msra.mxu0 %v886_v7  ;;  %v898_v15 = vld [vmem:[#allocation6 + $0x80] ss:$16 sps:$4 sm:$0xff]   ;;  %v899_v16 = vld [vmem:[#allocation6 + $0x88] ss:$16 sps:$4 sm:$0xff]   ;;  %v900_v17 = vld [vmem:[#allocation6 + $0x64] ss:$16 sps:$4 sm:$0xff]  }
  0x24   :  { %549 = vmatpush1.bf16.msra.mxu1 %v887_v8  ;;  %497 = vmatprep.subr.bf16.mxu0 %v888_v9  ;;  %v902_v18 = vld [vmem:[#allocation6 + $0x6c] ss:$16 sps:$4 sm:$0xff]   ;;  %v904_v19 = vld [vmem:[#allocation6 + $0x60] ss:$16 sps:$4 sm:$0xff]   ;;  %v905_v20 = vld [vmem:[#allocation6 + $0x68] ss:$16 sps:$4 sm:$0xff]  }
  0x25   :  { %550 = vmatprep.subr.bf16.mxu1 %v890_v10  ;;  %v906_v21 = vld [vmem:[#allocation6 + $0x44] ss:$16 sps:$4 sm:$0xff]   ;;  %v908_v22 = vld [vmem:[#allocation6 + $0x4c] ss:$16 sps:$4 sm:$0xff]   ;;  %v910_v23 = vld [vmem:[#allocation6 + $0x40] ss:$16 sps:$4 sm:$0xff]  }
  0x26   :  { %v911_v24 = vld [vmem:[#allocation6 + $0x48] ss:$16 sps:$4 sm:$0xff]   ;;  %v912_v25 = vld [vmem:[#allocation6 + $0x24] ss:$16 sps:$4 sm:$0xff]   ;;  %v914_v26 = vld [vmem:[#allocation6 + $0x2c] ss:$16 sps:$4 sm:$0xff]  }
  0x27   :  { %498 = vmatpush1.bf16.msra.mxu0 %v892_v11  ;;  %v916_v27 = vld [vmem:[#allocation6 + $0x20] ss:$16 sps:$4 sm:$0xff]   ;;  %v917_v28 = vld [vmem:[#allocation6 + $0x28] ss:$16 sps:$4 sm:$0xff]   ;;  %v918_v29 = vld [vmem:[#allocation6 + $0x4] ss:$16 sps:$4 sm:$0xff]  }
  0x28   :  { %551 = vmatpush1.bf16.msra.mxu1 %v893_v12  ;;  %499 = vmatprep.subr.bf16.mxu0 %v894_v13  ;;  %v920_v30 = vld [vmem:[#allocation6 + $0xc] ss:$16 sps:$4 sm:$0xff]   ;;  %v922_v31 = vld [vmem:[#allocation6] ss:$16 sps:$4 sm:$0xff]   ;;  %v923_v32 = vld [vmem:[#allocation6 + $0x8] ss:$16 sps:$4 sm:$0xff]  }
  0x29   :  { %552 = vmatprep.subr.bf16.mxu1 %v896_v14  ;;  %v924_v33 = vld [vmem:[#allocation6 + $0x1e4] ss:$16 sps:$4 sm:$0xff]   ;;  %v926_v34 = vld [vmem:[#allocation6 + $0x1ec] ss:$16 sps:$4 sm:$0xff]   ;;  %v928_v35 = vld [vmem:[#allocation6 + $0x1e0] ss:$16 sps:$4 sm:$0xff]  }
  0x2a   :  { %v929_v36 = vld [vmem:[#allocation6 + $0x1e8] ss:$16 sps:$4 sm:$0xff]   ;;  %v930_v37 = vld [vmem:[#allocation6 + $0x1c4] ss:$16 sps:$4 sm:$0xff]   ;;  %v932_v38 = vld [vmem:[#allocation6 + $0x1cc] ss:$16 sps:$4 sm:$0xff]  }
  0x2b   :  { %500 = vmatpush1.bf16.msra.mxu0 %v898_v15  ;;  %v934_v39 = vld [vmem:[#allocation6 + $0x1c0] ss:$16 sps:$4 sm:$0xff]   ;;  %v935_v40 = vld [vmem:[#allocation6 + $0x1c8] ss:$16 sps:$4 sm:$0xff]   ;;  %v936_v41 = vld [vmem:[#allocation6 + $0x1a4] ss:$16 sps:$4 sm:$0xff]  }
  0x2c   :  { %553 = vmatpush1.bf16.msra.mxu1 %v899_v16  ;;  %501 = vmatprep.subr.bf16.mxu0 %v900_v17  ;;  %v938_v42 = vld [vmem:[#allocation6 + $0x1ac] ss:$16 sps:$4 sm:$0xff]   ;;  %v940_v43 = vld [vmem:[#allocation6 + $0x1a0] ss:$16 sps:$4 sm:$0xff]   ;;  %v941_v44 = vld [vmem:[#allocation6 + $0x1a8] ss:$16 sps:$4 sm:$0xff]  }
  0x2d   :  { %554 = vmatprep.subr.bf16.mxu1 %v902_v18  ;;  %v942_v45 = vld [vmem:[#allocation6 + $0x184] ss:$16 sps:$4 sm:$0xff]   ;;  %v944_v46 = vld [vmem:[#allocation6 + $0x18c] ss:$16 sps:$4 sm:$0xff]   ;;  %v946_v47 = vld [vmem:[#allocation6 + $0x180] ss:$16 sps:$4 sm:$0xff]  }
  0x2e   :  { %v974_v48 = vld [vmem:[#allocation3 + $0x4] ss:$8 sps:$4 sm:$0xff]   ;;  %v947_v49 = vld [vmem:[#allocation6 + $0x188] ss:$16 sps:$4 sm:$0xff]   ;;  %v952_v52 = vld [vmem:[#allocation6 + $0x160] ss:$16 sps:$4 sm:$0xff]  }
  0x2f   :  { %502 = vmatpush1.bf16.msra.mxu0 %v904_v19  ;;  %v948_v50 = vld [vmem:[#allocation6 + $0x164] ss:$16 sps:$4 sm:$0xff]   ;;  %v950_v51 = vld [vmem:[#allocation6 + $0x16c] ss:$16 sps:$4 sm:$0xff]   ;;  %525 = vmatprep.mubr.bf16.mxu0 %v974_v48  ;;  %v953_v53 = vld [vmem:[#allocation6 + $0x168] ss:$16 sps:$4 sm:$0xff]  }
  0x30   :  { %555 = vmatpush1.bf16.msra.mxu1 %v905_v20  ;;  %503 = vmatprep.subr.bf16.mxu0 %v906_v21  ;;  %v954_v54 = vld [vmem:[#allocation6 + $0x144] ss:$16 sps:$4 sm:$0xff]   ;;  %v956_v55 = vld [vmem:[#allocation6 + $0x14c] ss:$16 sps:$4 sm:$0xff]   ;;  %v958_v56 = vld [vmem:[#allocation6 + $0x140] ss:$16 sps:$4 sm:$0xff]  }
  0x31   :  { %556 = vmatprep.subr.bf16.mxu1 %v908_v22  ;;  %578 = vmatprep.mubr.bf16.mxu1 %v974_v48  ;;  %v959_v57 = vld [vmem:[#allocation6 + $0x148] ss:$16 sps:$4 sm:$0xff]   ;;  %v960_v58 = vld [vmem:[#allocation6 + $0x124] ss:$16 sps:$4 sm:$0xff]   ;;  %v962_v59 = vld [vmem:[#allocation6 + $0x12c] ss:$16 sps:$4 sm:$0xff]  }
  0x32   :  { %v964_v60 = vld [vmem:[#allocation6 + $0x120] ss:$16 sps:$4 sm:$0xff]   ;;  %v965_v61 = vld [vmem:[#allocation6 + $0x128] ss:$16 sps:$4 sm:$0xff]   ;;  %v966_v62 = vld [vmem:[#allocation6 + $0x104] ss:$16 sps:$4 sm:$0xff]  }
  0x33   :  { %504 = vmatpush1.bf16.msra.mxu0 %v910_v23  ;;  %v968_v63 = vld [vmem:[#allocation6 + $0x10c] ss:$16 sps:$4 sm:$0xff]   ;;  %v970_v0 = vld [vmem:[#allocation6 + $0x100] ss:$16 sps:$4 sm:$0xff]   ;;  %v971_v1 = vld [vmem:[#allocation6 + $0x108] ss:$16 sps:$4 sm:$0xff]  }
  0x34   :  { %557 = vmatpush1.bf16.msra.mxu1 %v911_v24  ;;  %505 = vmatprep.subr.bf16.mxu0 %v912_v25  ;;  %v972_v2 = vld [vmem:[#allocation3] ss:$8 sps:$4 sm:$0xff]   ;;  %v975_v3 = vld [vmem:[#allocation3 + $0x14] ss:$8 sps:$4 sm:$0xff]   ;;  %v977_v4 = vld [vmem:[#allocation3 + $0x10] ss:$8 sps:$4 sm:$0xff]  }
  0x35   :  { %558 = vmatprep.subr.bf16.mxu1 %v914_v26  ;;  %v1124_v21 = vmov 0.0   ;;  %v1126_v22 = vmov 0.0   ;;  %v1128_v23 = vmov 0.0   ;;  %v1130_v24 = vmov 0.0  }
  0x37   :  { %506 = vmatpush1.bf16.msra.mxu0 %v916_v27 }
  0x38   :  { %559 = vmatpush1.bf16.msra.mxu1 %v917_v28  ;;  %507 = vmatprep.subr.bf16.mxu0 %v918_v29 }
  0x39   :  { %560 = vmatprep.subr.bf16.mxu1 %v920_v30 }
  0x3b   :  { %508 = vmatpush1.bf16.msra.mxu0 %v922_v31 }
  0x3c   :  { %561 = vmatpush1.bf16.msra.mxu1 %v923_v32  ;;  %509 = vmatprep.subr.bf16.mxu0 %v924_v33 }
  0x3d   :  { %562 = vmatprep.subr.bf16.mxu1 %v926_v34 }
  0x3f   :  { %510 = vmatpush2.bf16.msra.mxu0 %v928_v35 }
  0x40   :  { %563 = vmatpush2.bf16.msra.mxu1 %v929_v36  ;;  %511 = vmatprep.subr.bf16.mxu0 %v930_v37 }
  0x41   :  { %564 = vmatprep.subr.bf16.mxu1 %v932_v38 }
  0x43   :  { %512 = vmatpush2.bf16.msra.mxu0 %v934_v39 }
  0x44   :  { %565 = vmatpush2.bf16.msra.mxu1 %v935_v40  ;;  %513 = vmatprep.subr.bf16.mxu0 %v936_v41 }
  0x45   :  { %566 = vmatprep.subr.bf16.mxu1 %v938_v42 }
  0x47   :  { %514 = vmatpush2.bf16.msra.mxu0 %v940_v43 }
  0x48   :  { %567 = vmatpush2.bf16.msra.mxu1 %v941_v44  ;;  %515 = vmatprep.subr.bf16.mxu0 %v942_v45 }
  0x49   :  { %568 = vmatprep.subr.bf16.mxu1 %v944_v46 }
  0x4b   :  { %516 = vmatpush2.bf16.msra.mxu0 %v946_v47 }
  0x4c   :  { %569 = vmatpush2.bf16.msra.mxu1 %v947_v49  ;;  %517 = vmatprep.subr.bf16.mxu0 %v948_v50 }
  0x4d   :  { %570 = vmatprep.subr.bf16.mxu1 %v950_v51 }
  0x4f   :  { %518 = vmatpush2.bf16.msra.mxu0 %v952_v52 }
  0x50   :  { %571 = vmatpush2.bf16.msra.mxu1 %v953_v53  ;;  %519 = vmatprep.subr.bf16.mxu0 %v954_v54 }
  0x51   :  { %572 = vmatprep.subr.bf16.mxu1 %v956_v55 }
  0x53   :  { %520 = vmatpush2.bf16.msra.mxu0 %v958_v56 }
  0x54   :  { %573 = vmatpush2.bf16.msra.mxu1 %v959_v57  ;;  %521 = vmatprep.subr.bf16.mxu0 %v960_v58 }
  0x55   :  { %574 = vmatprep.subr.bf16.mxu1 %v962_v59 }
  0x57   :  { %522 = vmatpush2.bf16.msra.mxu0 %v964_v60 }
  0x58   :  { %575 = vmatpush2.bf16.msra.mxu1 %v965_v61  ;;  %523 = vmatprep.subr.bf16.mxu0 %v966_v62 }
  0x59   :  { %576 = vmatprep.subr.bf16.mxu1 %v968_v63 }
  0x5b   :  { %524 = vmatpush2.bf16.msra.mxu0 %v970_v0 }
  0x5c   :  { %577 = vmatpush2.bf16.msra.mxu1 %v971_v1 }
  0x5e   :  { %526 = vmatmul.mubr.bf16.vlgmr.msra.gmra.mxu0 %v972_v2 }
  0x5f   :  { %579 = vmatmul.mubr.bf16.vlgmr.msra.gmra.mxu1 %v972_v2  ;;  %535 = vmatprep.mubr.bf16.mxu0 %v975_v3 }
  0x60   :  { %588 = vmatprep.mubr.bf16.mxu1 %v975_v3 }
  0x66   :  { %536 = vmatmul.mubr.bf16.gmra.mxu0 %v977_v4 }
  0x67   :  { %589 = vmatmul.mubr.bf16.gmra.mxu1 %v977_v4 }
 0x11e   :  { %v527_v5 = vpop.f32.mrf.mxu0 }
 0x11f   :  { %v580_v6 = vpop.f32.mrf.mxu1  ;;  %615 = vst [vmem:[#allocation2] sm:$0xff] %v527_v5 }
 0x120   :  { %v529_v7 = vpop.f32.mrf.mxu0  ;;  %617 = vst [vmem:[#allocation2 + $0x10] sm:$0xff] %v580_v6 }
 0x121   :  { %v582_v8 = vpop.f32.mrf.mxu1  ;;  %616 = vst [vmem:[#allocation2 + $0x8] sm:$0xff] %v529_v7 }
 0x122   :  { %v531_v9 = vpop.f32.mrf.mxu0  ;;  %618 = vst [vmem:[#allocation2 + $0x18] sm:$0xff] %v582_v8 }
 0x123   :  { %v584_v10 = vpop.f32.mrf.mxu1  ;;  %619 = vst [vmem:[#allocation2 + $0x20] sm:$0xff] %v531_v9 }
 0x124   :  { %v533_v11 = vpop.f32.mrf.mxu0  ;;  %621 = vst [vmem:[#allocation2 + $0x30] sm:$0xff] %v584_v10 }
 0x125   :  { %v586_v12 = vpop.f32.mrf.mxu1  ;;  %620 = vst [vmem:[#allocation2 + $0x28] sm:$0xff] %v533_v11 }
 0x126   :  { %v537_v13 = vpop.f32.mrf.mxu0  ;;  %622 = vst [vmem:[#allocation2 + $0x38] sm:$0xff] %v586_v12 }
 0x127   :  { %v590_v14 = vpop.f32.mrf.mxu1  ;;  %623 = vst [vmem:[#allocation2 + $0x40] sm:$0xff] %v537_v13 }
 0x128   :  { %v539_v15 = vpop.f32.mrf.mxu0  ;;  %625 = vst [vmem:[#allocation2 + $0x50] sm:$0xff] %v590_v14 }
 0x129   :  { %v592_v16 = vpop.f32.mrf.mxu1  ;;  %624 = vst [vmem:[#allocation2 + $0x48] sm:$0xff] %v539_v15 }
 0x12a   :  { %v541_v17 = vpop.f32.mrf.mxu0  ;;  %626 = vst [vmem:[#allocation2 + $0x58] sm:$0xff] %v592_v16 }
 0x12b   :  { %v594_v18 = vpop.f32.mrf.mxu1  ;;  %627 = vst [vmem:[#allocation2 + $0x60] sm:$0xff] %v541_v17 }
 0x12c   :  { %v543_v19 = vpop.f32.mrf.mxu0  ;;  %629 = vst [vmem:[#allocation2 + $0x70] sm:$0xff] %v594_v18 }
 0x12d   :  { %v596_v20 = vpop.f32.mrf.mxu1  ;;  %628 = vst [vmem:[#allocation2 + $0x68] sm:$0xff] %v543_v19 }
 0x12e   :  { %630 = vst [vmem:[#allocation2 + $0x78] sm:$0xff] %v596_v20 }
 0x12f LB: > { %s825_s1 = sshll.u32 %s1090_s0, 7  ;;  %s643_s0 = sadd.s32 1, %s1090_s0   ;;  %s1090_s0 = sphi %s1132_s0, %s643_s0   ;;  %v1086_v24 = vphi %v1130_v24, %v1176_v24   ;;  %v1082_v23 = vphi %v1128_v23, %v1175_v23   ;;  %v1078_v22 = vphi %v1126_v22, %v1174_v22   ;;  %v1074_v21 = vphi %v1124_v21, %v1173_v21  }
 0x130   : > { %s649_s23 = sshra.s32 %s825_s1, 7  ;;  %s657_s24 = sadd.s32 256, %s825_s1 }
 0x131   : > { %s826_s25 = sshll.u32 %s649_s23, 3  ;;  %s658_s26 = sshra.s32 %s657_s24, 7 }
 0x132   : > { %s827_s27 = sshll.u32 %s658_s26, 3  ;;  %s652_s28 = scalar_lea.vmem [#allocation2], %s826_s25 }
 0x133   : > { %s661_s29 = scalar_lea.vmem [#allocation2], %s827_s27  ;;  %p640_p10 = scmp.ge.s32.totalorder %s643_s0, 2  }
 0x134   :  { %s1099_s30 = smov (%p640_p10), [#allocation8]  }
 0x135   : > { %v653_v25 = vld [vmem:[%s652_s28] sm:$0xff]  ;;  %s723_s3 = sshll.u32 (%p640_p10), %s1099_s30, 4  ;;  %s724_s3 = int_to_ptr.vmem [resolvable:$true] %s723_s3 }
 0x136   : > { %v654_v26 = vld [vmem:[%s652_s28 + $0x20] sm:$0xff]  ;;  %v666_v31 = vmul.f32 %v653_v25, %v653_v25  ;;  %s1026_s4 = scalar_lea.vmem (%p640_p10), %s724_s3, 512  ;;  %p1031_p12 = scmp.lt.s32.totalorder (%p640_p10), %s724_s3, %s724_s3 }
 0x137   : > { %v655_v27 = vld [vmem:[%s652_s28 + $0x40] sm:$0xff]  ;;  %v667_v32 = vmul.f32 %v654_v26, %v654_v26  ;;  %p1027_p11 = scmp.ne.s32.totalorder (%p640_p10), %s724_s3, %s1026_s4  ;;  %p1032_p13 = scmp.lt.s32.totalorder (%p640_p10), %s1026_s4, %s1026_s4 }
 0x138   : > { %v656_v28 = vld [vmem:[%s652_s28 + $0x60] sm:$0xff]  ;;  %v668_v33 = vmul.f32 %v655_v27, %v655_v27 }
 0x139   : > { %v662_v29 = vld [vmem:[%s661_s29] sm:$0xff]  ;;  %v669_v36 = vmul.f32 %v656_v28, %v656_v28  ;;  %p1033_p0 = por (%p640_p10), %p1032_p13, %p1031_p12 }
 0x13a   : > { %v663_v30 = vld [vmem:[%s661_s29 + $0x20] sm:$0xff]  ;;  %v670_v37 = vmul.f32 %v662_v29, %v662_v29 }
 0x13b   : > { %v664_v34 = vld [vmem:[%s661_s29 + $0x40] sm:$0xff]  ;;  %v671_v38 = vmul.f32 %v663_v30, %v663_v30  ;;  %p1034_p1 = pnand (%p640_p10), %p1033_p0, %p1027_p11 }
 0x13c   : > { %v665_v35 = vld [vmem:[%s661_s29 + $0x60] sm:$0xff]  ;;  %v672_v39 = vmul.f32 %v664_v34, %v664_v34  ;;  %v674_v41 = vadd.f32 %v670_v37, %v666_v31 }
 0x13d   : > { %v673_v40 = vmul.f32 %v665_v35, %v665_v35  ;;  %v675_v42 = vadd.f32 %v671_v38, %v667_v32 }
 0x13e   : > { %v676_v43 = vadd.f32 %v672_v39, %v668_v33  ;;  %978 = vrsqrt.f32 %v674_v41  ;;  %vm680_vm0 = vcmp.eq.f32.partialorder %v674_v41, inf  ;;  %vm682_vm1 = vcmp.eq.f32.partialorder %v674_v41, 0.0 }
 0x13f   : > { %v677_v44 = vadd.f32 %v673_v40, %v669_v36  ;;  %980 = vrsqrt.f32 %v675_v42  ;;  %v683_v46 = vand.u32 2147483648, %v674_v41  ;;  %vm687_vm2 = vcmp.eq.f32.partialorder %v675_v42, inf }
 0x140   : > { %982 = vrsqrt.f32 %v676_v43  ;;  %vm689_vm3 = vcmp.eq.f32.partialorder %v675_v42, 0.0  ;;  %v690_v49 = vand.u32 2147483648, %v675_v42  ;;  %vm694_vm4 = vcmp.eq.f32.partialorder %v676_v43, inf }
 0x141   : > { %984 = vrsqrt.f32 %v677_v44  ;;  %vm696_vm5 = vcmp.eq.f32.partialorder %v676_v43, 0.0  ;;  %v697_v52 = vand.u32 2147483648, %v676_v43  ;;  %vm701_vm6 = vcmp.eq.f32.partialorder %v677_v44, inf }
 0x142   : > { %v704_v56 = vand.u32 2147483648, %v677_v44  ;;  %vm703_vm7 = vcmp.eq.f32.partialorder %v677_v44, 0.0 }
 0x14b   : > { %v979_v45 = vpop.eup %978 }
 0x14c   : > { %v981_v47 = vpop.eup %980  ;;  %v679_v48 = vmul.f32 %v979_v45, %v674_v41 }
 0x14d   : > { %v983_v50 = vpop.eup %982  ;;  %v686_v51 = vmul.f32 %v981_v47, %v675_v42 }
 0x14e   : > { %v985_v53 = vpop.eup %984  ;;  %v681_v54 = vsel %vm680_vm0, %v674_v41, %v679_v48  ;;  %v693_v55 = vmul.f32 %v983_v50, %v676_v43 }
 0x14f   : > { %v684_v57 = vsel %vm682_vm1, %v683_v46, %v681_v54  ;;  %v688_v58 = vsel %vm687_vm2, %v675_v42, %v686_v51  ;;  %v700_v59 = vmul.f32 %v985_v53, %v677_v44 }
 0x150   : > { %v691_v60 = vsel %vm689_vm3, %v690_v49, %v688_v58  ;;  %v695_v61 = vsel %vm694_vm4, %v676_v43, %v693_v55  ;;  %v706_v62 = vadd.f32 %v1086_v24, %v684_v57  }
 0x151   : > { %v698_v63 = vsel %vm696_vm5, %v697_v52, %v695_v61  ;;  %v702_v0 = vsel %vm701_vm6, %v677_v44, %v700_v59  ;;  %v707_v1 = vadd.f32 %v1082_v23, %v691_v60   ;;  %642 = sbr.rel (!%p640_p10) target bundleno = 303 (0x12f), region = 57 }
 0x152   : > { %v705_v2 = vsel %vm703_vm7, %v704_v56, %v702_v0  ;;  %v708_v3 = vadd.f32 %v1078_v22, %v698_v63   ;;  %v1176_v24 = vmov %v706_v62  ;;  %714 = vst [vmem:[#allocation8] sm:$0xff] (%p640_p10), %v706_v62 }
 0x153   : > { %v709_v4 = vadd.f32 %v1074_v21, %v705_v2   ;;  %v1175_v23 = vmov %v707_v1  ;;  %715 = vst [vmem:[#allocation8 + $0x8] sm:$0xff] (%p640_p10), %v707_v1 }
 0x154   : > { %v1174_v22 = vmov %v708_v3  ;;  %716 = vst [vmem:[#allocation8 + $0x10] sm:$0xff] (%p640_p10), %v708_v3 }
 0x155   : > { %v1173_v21 = vmov %v709_v4  ;;  %717 = vst [vmem:[#allocation8 + $0x18] sm:$0xff] (%p640_p10), %v709_v4 }
 0x156   :  { %1037 = shalt.err (!%p1034_p1)
}
 0x157   :  { %729 = dma.vmem_to_hbm [thread:$0]  %s724_s3, 512, %s1172_s2, [#allocation5], %s1093_s12, %s1093_s12, %s1094_s13  }
 0x158   :  { %1070 = dma.done.wait [#allocation5], 512  }
 0x159   :  { %1071 = vsyncadd [#allocation5], 4294966784 }
 0x15a   :  { %733 = vsyncpa [#allocation4], 1 }
 0x15b   :  { %734 = vsyncpa [#allocation7], 1 }
 0x15c   :  { %735 = vsyncpa [#allocation5], 1 }

</bundles_post_ra>
